<compile_context>
chip_gen: v7x
topology: tpu7x:2x2x1
jax: 0.10.0
libtpu: 0.0.40
codegen_flags: <defaults>
</compile_context>

<pallas_src>
import functools

import jax
import jax.numpy as jnp
from jax import lax
from jax.experimental import pallas as pl
from jax.experimental.pallas import tpu as pltpu

_LANES = 128
_SUB = 8
_CHUNK = 32                       # sublane chunk: satisfies int8/bf16 min tiles
_TSUB_MAX = 2048                  # v7x-safe ceiling (review)
_LOGITS_VMEM_BUDGET = 20 * 1024 * 1024   # double-buffered logits byte budget


def _focal_kernel(x_ref, lab_ref, out_ref, *, gamma, ign_idx, alpha_list,
                  alpha_scalar, n_cls, tsub, chunk, rows_total,
                  tiles_per_split, need_row_mask):
    s = pl.program_id(0)          # core-split index
    i = pl.program_id(2)          # pixel-tile index within the split

    @pl.when(i == 0)
    def _():
        out_ref[...] = jnp.zeros_like(out_ref)

    tile_global = s * tiles_per_split + i
    n_chunks = tsub // chunk

    def chunk_body(j, acc):
        row0 = pl.multiple_of(j * chunk, chunk)
        # One int8->int32 unpack per chunk keeps all later compares in the
        # f32-friendly layout.
        lab = lab_ref[0, pl.ds(row0, chunk), :].astype(jnp.int32)   # (chunk,128)

        def cls(c):
            # one class plane of the chunk; upcast after the (possibly bf16) load
            return x_ref[0, c, pl.ds(row0, chunk), :].astype(jnp.float32)

        # Numerically stable log-softmax over the class planes; the class loop
        # is unrolled at trace time and every op is elementwise.
        m = cls(0)
        for c in range(1, n_cls):
            m = jnp.maximum(m, cls(c))

        sumexp = jnp.zeros_like(m)
        x_gather = jnp.zeros_like(m)                 # logit at the label
        alpha_g = jnp.zeros_like(m) if alpha_list is not None else None
        for c in range(n_cls):
            v = cls(c)
            hit = lab == c                           # one compare, reused below
            sumexp = sumexp + jnp.exp(v - m)
            x_gather = jnp.where(hit, v, x_gather)
            if alpha_list is not None:
                alpha_g = jnp.where(hit, alpha_list[c], alpha_g)

        lse = jnp.log(sumexp) + m
        logpt = x_gather - lse
        pt = jnp.exp(logpt)

        # (1 - pt)^gamma: repeated multiply for small integer gamma (default 2)
        omp = 1.0 - pt
        if isinstance(gamma, int) and 0 <= gamma <= 12:
            if gamma == 0:
                focal = jnp.ones_like(pt)
            else:
                focal = omp
                for _ in range(gamma - 1):
                    focal = focal * omp
        else:
            focal = jnp.power(jnp.maximum(omp, 0.0), gamma)

        if alpha_list is not None:
            loss = alpha_g * focal * (-logpt)
        else:
            loss = alpha_scalar * focal * (-logpt)

        # Drop ignored / padded positions (padded label rows are ignore_index).
        valid = lab != ign_idx
        if need_row_mask:
            # Only needed when the core split can revisit a clamped tile.
            r_local = lax.broadcasted_iota(jnp.int32, lab.shape, 0)
            g_row = tile_global * tsub + row0 + r_local
            valid = valid & (g_row < rows_total)
        loss = jnp.where(valid, loss, 0.0)

        # Fold the (chunk,128) losses into a lane-dense (8,128) partial.
        return acc + jnp.sum(loss.reshape(chunk // _SUB, _SUB, _LANES), axis=0)

    acc = lax.fori_loop(0, n_chunks, chunk_body,
                        jnp.zeros((_SUB, _LANES), jnp.float32))
    out_ref[...] += acc[None, None]


def focal_loss(preds, labels, *, alpha=1.0, gamma=2, num_classes=None,
               size_average=False, ignore_index=-1, tsub=1024):
    """preds: (B, C, H, W) float (f32 or bf16); labels: (B, H, W) int.

    Returns a scalar f32 (sum, or mean over non-ignored positions).
    """
    B, C, H, W = preds.shape
    if num_classes is None:
        num_classes = C
    HW = H * W

    x = preds.reshape(B, C, HW)                      # metadata-only view
    # Labels streamed as int8 when class ids / ignore_index fit (less HBM
    # traffic); values outside int8 range are assumed absent (trusted input).
    lab_dtype = jnp.int8 if (C <= 127 and -128 <= ignore_index <= 127) else jnp.int32
    lab = labels.reshape(B, HW).astype(lab_dtype)

    # Rare fallback: pad the pixel axis to a multiple of 128 lanes (one copy);
    # padded labels are ignore_index so they contribute nothing.
    if HW % _LANES != 0:
        pad = (-HW) % _LANES
        x = jnp.pad(x, ((0, 0), (0, 0), (0, pad)))
        lab = jnp.pad(lab, ((0, 0), (0, pad)), constant_values=ignore_index)
        HW += pad

    R = HW // _LANES
    x = x.reshape(B, C, R, _LANES)
    lab = lab.reshape(B, R, _LANES)

    chunk = _CHUNK
    itemsize = jnp.dtype(x.dtype).itemsize
    lab_itemsize = jnp.dtype(lab.dtype).itemsize

    # Pixel tile (sublanes): large enough to amortize the ~0.35us per-step
    # pipeline overhead, bounded so double-buffered logits stay well inside
    # every generation's scoped VMEM (v7x: 64 MiB physical / 32 MiB default).
    tsub = max(chunk, (int(tsub) // chunk) * chunk)
    tsub_budget = max(chunk,
                      (_LOGITS_VMEM_BUDGET // (2 * C * _LANES * itemsize))
                      // chunk * chunk)
    tsub = min(tsub, tsub_budget, _TSUB_MAX)
    r_ceil = ((R + chunk - 1) // chunk) * chunk
    tsub = min(tsub, r_ceil)

    n_tiles = pl.cdiv(R, tsub)

    # Pad labels (cheap, ~1/36th of the logits bytes) so the label block never
    # overhangs; padded rows are ignore_index and mask themselves.
    R_pad = n_tiles * tsub
    if R_pad != R:
        lab = jnp.pad(lab, ((0, 0), (0, R_pad - R), (0, 0)),
                      constant_values=ignore_index)

    # v7x has 2 TensorCores: when the batch axis alone cannot be sharded
    # evenly, add a leading parallel split over the pixel tiles.
    n_split = 2 if (B % 2 == 1 and n_tiles >= 2) else 1
    tiles_per_split = pl.cdiv(n_tiles, n_split)
    need_row_mask = (n_split * tiles_per_split) != n_tiles
    last_tile = n_tiles - 1

    def x_map(split, b, i):
        t = split * tiles_per_split + i
        if need_row_mask:
            t = jnp.minimum(t, last_tile)      # keep the DMA in bounds
        return (b, 0, t, 0)

    def lab_map(split, b, i):
        t = split * tiles_per_split + i
        if need_row_mask:
            t = jnp.minimum(t, last_tile)
        return (b, t, 0)

    if isinstance(alpha, (list, tuple)):
        assert len(alpha) == num_classes
        alpha_list = tuple(float(a) for a in alpha)
        alpha_scalar = None
    else:
        alpha_list = None
        alpha_scalar = float(alpha)

    kernel = functools.partial(
        _focal_kernel, gamma=gamma, ign_idx=int(ignore_index),
        alpha_list=alpha_list, alpha_scalar=alpha_scalar,
        n_cls=C, tsub=tsub, chunk=chunk, rows_total=R,
        tiles_per_split=tiles_per_split, need_row_mask=need_row_mask)

    # Explicit scoped-VMEM limit: covers the double-buffered blocks with slack
    # (matters on v5e whose default scoped limit is 16 MiB).
    x_blk = C * tsub * _LANES * itemsize
    lab_blk = tsub * _LANES * lab_itemsize
    needed = 2 * (x_blk + lab_blk) + (2 << 20)
    vmem_limit = int(min(max(needed, 32 * 1024 * 1024), 100 * 1024 * 1024))

    cost = pl.CostEstimate(
        flops=int(B * HW * (10 * C + 12)),
        transcendentals=int(B * HW * (C + 2)),
        bytes_accessed=int(x.size * itemsize + lab.size * lab_itemsize
                           + n_split * B * _SUB * _LANES * 4),
    )

    partials = pl.pallas_call(
        kernel,
        out_shape=jax.ShapeDtypeStruct((n_split, B, _SUB, _LANES), jnp.float32),
        grid_spec=pltpu.PrefetchScalarGridSpec(
            num_scalar_prefetch=0,
            grid=(n_split, B, tiles_per_split),
            in_specs=[
                pl.BlockSpec((1, C, tsub, _LANES), x_map),
                pl.BlockSpec((1, tsub, _LANES), lab_map),
            ],
            out_specs=pl.BlockSpec((1, 1, _SUB, _LANES),
                                   lambda split, b, i: (split, b, 0, 0)),
        ),
        compiler_params=pltpu.CompilerParams(
            dimension_semantics=("parallel", "parallel", "arbitrary"),
            vmem_limit_bytes=vmem_limit),
        cost_estimate=cost,
    )(x, lab)

    total = jnp.sum(partials)
    if size_average:
        n_valid = jnp.sum((labels != ignore_index).astype(jnp.float32))
        total = total / n_valid
    return total


def _reference_focal_loss(preds, labels, *, alpha=1.0, gamma=2,
                          num_classes=None, size_average=False,
                          ignore_index=-1):
    """Pure-JAX reference mirroring the PyTorch forward (sanity check)."""
    B, C, H, W = preds.shape
    if num_classes is None:
        num_classes = C
    x = jnp.transpose(preds, (0, 2, 3, 1)).reshape(-1, C).astype(jnp.float32)
    lab = labels.reshape(-1).astype(jnp.int32)
    valid = lab != ignore_index
    lab_safe = jnp.where(valid, lab, 0)
    logsm = jax.nn.log_softmax(x, axis=1)
    logpt = jnp.take_along_axis(logsm, lab_safe[:, None], axis=1)[:, 0]
    pt = jnp.exp(logpt)
    if isinstance(alpha, (list, tuple)):
        alpha_vec = jnp.asarray(alpha, jnp.float32)
    else:
        alpha_vec = jnp.full((num_classes,), float(alpha), jnp.float32)
    a = alpha_vec[lab_safe]
    loss = a * (1.0 - pt) ** gamma * (-logpt)
    loss = jnp.where(valid, loss, 0.0)
    total = jnp.sum(loss)
    if size_average:
        total = total / jnp.sum(valid.astype(jnp.float32))
    return total


if __name__ == "__main__":
    key = jax.random.PRNGKey(0)
    keys = jax.random.split(key, 9)

    # Case 1: module defaults (scalar alpha, gamma=2, sum reduction), small
    # spatial extent exercising the overhanging logits block + ignore padding.
    B, C, H, W = 2, 9, 16, 16
    preds = jax.random.normal(keys[0], (B, C, H, W), dtype=jnp.float32)
    labels = jax.random.randint(keys[1], (B, H, W), 0, C, dtype=jnp.int32)
    labels = jnp.where(jax.random.bernoulli(keys[2], 0.2, (B, H, W)), -1, labels)
    out = jax.block_until_ready(
        focal_loss(preds, labels, alpha=1.0, gamma=2, num_classes=C,
                   size_average=False, ignore_index=-1))
    ref = _reference_focal_loss(preds, labels, alpha=1.0, gamma=2,
                                num_classes=C, size_average=False,
                                ignore_index=-1)
    assert jnp.allclose(out, ref, rtol=1e-3, atol=1e-3), (out, ref)

    # Case 2: multi-tile accumulation over the arbitrary axis, per-class alpha
    # list, mean reduction.
    B2, C2, H2, W2 = 2, 9, 64, 128
    preds2 = jax.random.normal(keys[3], (B2, C2, H2, W2), dtype=jnp.float32)
    labels2 = jax.random.randint(keys[4], (B2, H2, W2), 0, C2, dtype=jnp.int32)
    labels2 = jnp.where(jax.random.bernoulli(keys[5], 0.1, (B2, H2, W2)), -1,
                        labels2)
    alpha2 = [0.5 + 0.05 * c for c in range(C2)]
    out2 = jax.block_until_ready(
        focal_loss(preds2, labels2, alpha=alpha2, gamma=2, num_classes=C2,
                   size_average=True, ignore_index=-1, tsub=32))
    ref2 = _reference_focal_loss(preds2, labels2, alpha=alpha2, gamma=2,
                                 num_classes=C2, size_average=True,
                                 ignore_index=-1)
    assert jnp.allclose(out2, ref2, rtol=1e-3, atol=1e-3), (out2, ref2)

    # Case 3: bf16 logits, B=1 with an odd tile count -> exercises the
    # core-split axis, index-map clamp and in-kernel global-row mask.
    B3, C3, H3, W3 = 1, 9, 160, 128
    preds3 = jax.random.normal(keys[6], (B3, C3, H3, W3), dtype=jnp.bfloat16)
    labels3 = jax.random.randint(keys[7], (B3, H3, W3), 0, C3, dtype=jnp.int32)
    labels3 = jnp.where(jax.random.bernoulli(keys[8], 0.15, (B3, H3, W3)), -1,
                        labels3)
    out3 = jax.block_until_ready(
        focal_loss(preds3, labels3, alpha=1.0, gamma=2, num_classes=C3,
                   size_average=False, ignore_index=-1, tsub=64))
    ref3 = _reference_focal_loss(preds3, labels3, alpha=1.0, gamma=2,
                                 num_classes=C3, size_average=False,
                                 ignore_index=-1)
    assert jnp.allclose(out3, ref3, rtol=2e-3, atol=2e-3), (out3, ref3)

    print("KERNEL_OK")
</pallas_src>

<mosaic_0001>
module attributes {stable_mosaic.version = 11 : i64} {
  func.func @_focal_kernel(%arg0: i32, %arg1: i32, %arg2: i32, %arg3: memref<1x9x32x128xf32, #tpu.memory_space<vmem>>, %arg4: memref<1x32x128xi8, #tpu.memory_space<vmem>>, %arg5: memref<1x1x8x128xf32, #tpu.memory_space<vmem>>) attributes {dimension_semantics = [#tpu.dimension_semantics<parallel>, #tpu.dimension_semantics<parallel>, #tpu.dimension_semantics<arbitrary>], iteration_bounds = array<i64: 1, 2, 1>, scalar_prefetch = 0 : i64, scratch_operands = 0 : i64, tpu.core_type = #tpu.core_type<tc>, window_params = [{transform_indices = @transform_0, window_bounds = array<i64: 1, 9, 32, 128>}, {transform_indices = @transform_1, window_bounds = array<i64: 1, 32, 128>}, {transform_indices = @transform_2, window_bounds = array<i64: 1, 1, 8, 128>}]} {
    %c0_i32 = arith.constant 0 : i32
    %0 = arith.cmpi eq, %arg2, %c0_i32 : i32
    %1 = arith.extui %0 : i1 to i32
    %c0_i32_0 = arith.constant 0 : i32
    %2 = arith.cmpi ne, %1, %c0_i32_0 : i32
    scf.if %2 {
      %cst_66 = arith.constant 0.000000e+00 : f32
      %151 = vector.broadcast %cst_66 : f32 to vector<1x1x8x128xf32>
      %c0_67 = arith.constant 0 : index
      %c0_68 = arith.constant 0 : index
      %c0_69 = arith.constant 0 : index
      %c0_70 = arith.constant 0 : index
      %152 = vector.load %arg5[%c0_67, %c0_68, %c0_69, %c0_70] : memref<1x1x8x128xf32, #tpu.memory_space<vmem>>, vector<1x1x8x128xf32>
      tpu.vector_store %arg5[%c0_67, %c0_68, %c0_69, %c0_70], %151 {strides = array<i32>} : memref<1x1x8x128xf32, #tpu.memory_space<vmem>>, vector<1x1x8x128xf32>,
    } else {
    }
    %cst = arith.constant 0.000000e+00 : f32
    %3 = vector.broadcast %cst : f32 to vector<8x128xf32>
    %c0_i32_1 = arith.constant 0 : i32
    %c32_i32 = arith.constant 32 : i32
    %4 = arith.muli %c0_i32_1, %c32_i32 : i32
    %5 = tpu.assume_multiple %4, 32 : i32
    %c0 = arith.constant 0 : index
    %6 = arith.index_cast %5 : i32 to index
    %c0_2 = arith.constant 0 : index
    %7 = vector.load %arg4[%c0, %6, %c0_2] : memref<1x32x128xi8, #tpu.memory_space<vmem>>, vector<1x32x128xi8>
    %8 = vector.shape_cast %7 : vector<1x32x128xi8> to vector<32x128xi8>
    %9 = arith.extsi %8 : vector<32x128xi8> to vector<32x128xi32>
    %c0_3 = arith.constant 0 : index
    %c0_4 = arith.constant 0 : index
    %10 = arith.index_cast %5 : i32 to index
    %c0_5 = arith.constant 0 : index
    %11 = vector.load %arg3[%c0_3, %c0_4, %10, %c0_5] : memref<1x9x32x128xf32, #tpu.memory_space<vmem>>, vector<1x1x32x128xf32>
    %12 = vector.shape_cast %11 : vector<1x1x32x128xf32> to vector<32x128xf32>
    %c0_6 = arith.constant 0 : index
    %c1 = arith.constant 1 : index
    %13 = arith.index_cast %5 : i32 to index
    %c0_7 = arith.constant 0 : index
    %14 = vector.load %arg3[%c0_6, %c1, %13, %c0_7] : memref<1x9x32x128xf32, #tpu.memory_space<vmem>>, vector<1x1x32x128xf32>
    %15 = vector.shape_cast %14 : vector<1x1x32x128xf32> to vector<32x128xf32>
    %16 = arith.maximumf %12, %15 : vector<32x128xf32>
    %c0_8 = arith.constant 0 : index
    %c2 = arith.constant 2 : index
    %17 = arith.index_cast %5 : i32 to index
    %c0_9 = arith.constant 0 : index
    %18 = vector.load %arg3[%c0_8, %c2, %17, %c0_9] : memref<1x9x32x128xf32, #tpu.memory_space<vmem>>, vector<1x1x32x128xf32>
    %19 = vector.shape_cast %18 : vector<1x1x32x128xf32> to vector<32x128xf32>
    %20 = arith.maximumf %16, %19 : vector<32x128xf32>
    %c0_10 = arith.constant 0 : index
    %c3 = arith.constant 3 : index
    %21 = arith.index_cast %5 : i32 to index
    %c0_11 = arith.constant 0 : index
    %22 = vector.load %arg3[%c0_10, %c3, %21, %c0_11] : memref<1x9x32x128xf32, #tpu.memory_space<vmem>>, vector<1x1x32x128xf32>
    %23 = vector.shape_cast %22 : vector<1x1x32x128xf32> to vector<32x128xf32>
    %24 = arith.maximumf %20, %23 : vector<32x128xf32>
    %c0_12 = arith.constant 0 : index
    %c4 = arith.constant 4 : index
    %25 = arith.index_cast %5 : i32 to index
    %c0_13 = arith.constant 0 : index
    %26 = vector.load %arg3[%c0_12, %c4, %25, %c0_13] : memref<1x9x32x128xf32, #tpu.memory_space<vmem>>, vector<1x1x32x128xf32>
    %27 = vector.shape_cast %26 : vector<1x1x32x128xf32> to vector<32x128xf32>
    %28 = arith.maximumf %24, %27 : vector<32x128xf32>
    %c0_14 = arith.constant 0 : index
    %c5 = arith.constant 5 : index
    %29 = arith.index_cast %5 : i32 to index
    %c0_15 = arith.constant 0 : index
    %30 = vector.load %arg3[%c0_14, %c5, %29, %c0_15] : memref<1x9x32x128xf32, #tpu.memory_space<vmem>>, vector<1x1x32x128xf32>
    %31 = vector.shape_cast %30 : vector<1x1x32x128xf32> to vector<32x128xf32>
    %32 = arith.maximumf %28, %31 : vector<32x128xf32>
    %c0_16 = arith.constant 0 : index
    %c6 = arith.constant 6 : index
    %33 = arith.index_cast %5 : i32 to index
    %c0_17 = arith.constant 0 : index
    %34 = vector.load %arg3[%c0_16, %c6, %33, %c0_17] : memref<1x9x32x128xf32, #tpu.memory_space<vmem>>, vector<1x1x32x128xf32>
    %35 = vector.shape_cast %34 : vector<1x1x32x128xf32> to vector<32x128xf32>
    %36 = arith.maximumf %32, %35 : vector<32x128xf32>
    %c0_18 = arith.constant 0 : index
    %c7 = arith.constant 7 : index
    %37 = arith.index_cast %5 : i32 to index
    %c0_19 = arith.constant 0 : index
    %38 = vector.load %arg3[%c0_18, %c7, %37, %c0_19] : memref<1x9x32x128xf32, #tpu.memory_space<vmem>>, vector<1x1x32x128xf32>
    %39 = vector.shape_cast %38 : vector<1x1x32x128xf32> to vector<32x128xf32>
    %40 = arith.maximumf %36, %39 : vector<32x128xf32>
    %c0_20 = arith.constant 0 : index
    %c8 = arith.constant 8 : index
    %41 = arith.index_cast %5 : i32 to index
    %c0_21 = arith.constant 0 : index
    %42 = vector.load %arg3[%c0_20, %c8, %41, %c0_21] : memref<1x9x32x128xf32, #tpu.memory_space<vmem>>, vector<1x1x32x128xf32>
    %43 = vector.shape_cast %42 : vector<1x1x32x128xf32> to vector<32x128xf32>
    %44 = arith.maximumf %40, %43 : vector<32x128xf32>
    %cst_22 = arith.constant 0.000000e+00 : f32
    %45 = vector.broadcast %cst_22 : f32 to vector<32x128xf32>
    %cst_23 = arith.constant 0.000000e+00 : f32
    %46 = vector.broadcast %cst_23 : f32 to vector<32x128xf32>
    %c0_24 = arith.constant 0 : index
    %c0_25 = arith.constant 0 : index
    %47 = arith.index_cast %5 : i32 to index
    %c0_26 = arith.constant 0 : index
    %48 = vector.load %arg3[%c0_24, %c0_25, %47, %c0_26] : memref<1x9x32x128xf32, #tpu.memory_space<vmem>>, vector<1x1x32x128xf32>
    %49 = vector.shape_cast %48 : vector<1x1x32x128xf32> to vector<32x128xf32>
    %c0_i32_27 = arith.constant 0 : i32
    %50 = vector.broadcast %c0_i32_27 : i32 to vector<32x128xi32>
    %51 = arith.cmpi eq, %9, %50 : vector<32x128xi32>
    %52 = arith.subf %49, %44 : vector<32x128xf32>
    %53 = math.exp %52 : vector<32x128xf32>
    %54 = arith.addf %45, %53 : vector<32x128xf32>
    %55 = arith.select %51, %49, %46 : vector<32x128xi1>, vector<32x128xf32>
    %c0_28 = arith.constant 0 : index
    %c1_29 = arith.constant 1 : index
    %56 = arith.index_cast %5 : i32 to index
    %c0_30 = arith.constant 0 : index
    %57 = vector.load %arg3[%c0_28, %c1_29, %56, %c0_30] : memref<1x9x32x128xf32, #tpu.memory_space<vmem>>, vector<1x1x32x128xf32>
    %58 = vector.shape_cast %57 : vector<1x1x32x128xf32> to vector<32x128xf32>
    %c1_i32 = arith.constant 1 : i32
    %59 = vector.broadcast %c1_i32 : i32 to vector<32x128xi32>
    %60 = arith.cmpi eq, %9, %59 : vector<32x128xi32>
    %61 = arith.subf %58, %44 : vector<32x128xf32>
    %62 = math.exp %61 : vector<32x128xf32>
    %63 = arith.addf %54, %62 : vector<32x128xf32>
    %64 = arith.select %60, %58, %55 : vector<32x128xi1>, vector<32x128xf32>
    %c0_31 = arith.constant 0 : index
    %c2_32 = arith.constant 2 : index
    %65 = arith.index_cast %5 : i32 to index
    %c0_33 = arith.constant 0 : index
    %66 = vector.load %arg3[%c0_31, %c2_32, %65, %c0_33] : memref<1x9x32x128xf32, #tpu.memory_space<vmem>>, vector<1x1x32x128xf32>
    %67 = vector.shape_cast %66 : vector<1x1x32x128xf32> to vector<32x128xf32>
    %c2_i32 = arith.constant 2 : i32
    %68 = vector.broadcast %c2_i32 : i32 to vector<32x128xi32>
    %69 = arith.cmpi eq, %9, %68 : vector<32x128xi32>
    %70 = arith.subf %67, %44 : vector<32x128xf32>
    %71 = math.exp %70 : vector<32x128xf32>
    %72 = arith.addf %63, %71 : vector<32x128xf32>
    %73 = arith.select %69, %67, %64 : vector<32x128xi1>, vector<32x128xf32>
    %c0_34 = arith.constant 0 : index
    %c3_35 = arith.constant 3 : index
    %74 = arith.index_cast %5 : i32 to index
    %c0_36 = arith.constant 0 : index
    %75 = vector.load %arg3[%c0_34, %c3_35, %74, %c0_36] : memref<1x9x32x128xf32, #tpu.memory_space<vmem>>, vector<1x1x32x128xf32>
    %76 = vector.shape_cast %75 : vector<1x1x32x128xf32> to vector<32x128xf32>
    %c3_i32 = arith.constant 3 : i32
    %77 = vector.broadcast %c3_i32 : i32 to vector<32x128xi32>
    %78 = arith.cmpi eq, %9, %77 : vector<32x128xi32>
    %79 = arith.subf %76, %44 : vector<32x128xf32>
    %80 = math.exp %79 : vector<32x128xf32>
    %81 = arith.addf %72, %80 : vector<32x128xf32>
    %82 = arith.select %78, %76, %73 : vector<32x128xi1>, vector<32x128xf32>
    %c0_37 = arith.constant 0 : index
    %c4_38 = arith.constant 4 : index
    %83 = arith.index_cast %5 : i32 to index
    %c0_39 = arith.constant 0 : index
    %84 = vector.load %arg3[%c0_37, %c4_38, %83, %c0_39] : memref<1x9x32x128xf32, #tpu.memory_space<vmem>>, vector<1x1x32x128xf32>
    %85 = vector.shape_cast %84 : vector<1x1x32x128xf32> to vector<32x128xf32>
    %c4_i32 = arith.constant 4 : i32
    %86 = vector.broadcast %c4_i32 : i32 to vector<32x128xi32>
    %87 = arith.cmpi eq, %9, %86 : vector<32x128xi32>
    %88 = arith.subf %85, %44 : vector<32x128xf32>
    %89 = math.exp %88 : vector<32x128xf32>
    %90 = arith.addf %81, %89 : vector<32x128xf32>
    %91 = arith.select %87, %85, %82 : vector<32x128xi1>, vector<32x128xf32>
    %c0_40 = arith.constant 0 : index
    %c5_41 = arith.constant 5 : index
    %92 = arith.index_cast %5 : i32 to index
    %c0_42 = arith.constant 0 : index
    %93 = vector.load %arg3[%c0_40, %c5_41, %92, %c0_42] : memref<1x9x32x128xf32, #tpu.memory_space<vmem>>, vector<1x1x32x128xf32>
    %94 = vector.shape_cast %93 : vector<1x1x32x128xf32> to vector<32x128xf32>
    %c5_i32 = arith.constant 5 : i32
    %95 = vector.broadcast %c5_i32 : i32 to vector<32x128xi32>
    %96 = arith.cmpi eq, %9, %95 : vector<32x128xi32>
    %97 = arith.subf %94, %44 : vector<32x128xf32>
    %98 = math.exp %97 : vector<32x128xf32>
    %99 = arith.addf %90, %98 : vector<32x128xf32>
    %100 = arith.select %96, %94, %91 : vector<32x128xi1>, vector<32x128xf32>
    %c0_43 = arith.constant 0 : index
    %c6_44 = arith.constant 6 : index
    %101 = arith.index_cast %5 : i32 to index
    %c0_45 = arith.constant 0 : index
    %102 = vector.load %arg3[%c0_43, %c6_44, %101, %c0_45] : memref<1x9x32x128xf32, #tpu.memory_space<vmem>>, vector<1x1x32x128xf32>
    %103 = vector.shape_cast %102 : vector<1x1x32x128xf32> to vector<32x128xf32>
    %c6_i32 = arith.constant 6 : i32
    %104 = vector.broadcast %c6_i32 : i32 to vector<32x128xi32>
    %105 = arith.cmpi eq, %9, %104 : vector<32x128xi32>
    %106 = arith.subf %103, %44 : vector<32x128xf32>
    %107 = math.exp %106 : vector<32x128xf32>
    %108 = arith.addf %99, %107 : vector<32x128xf32>
    %109 = arith.select %105, %103, %100 : vector<32x128xi1>, vector<32x128xf32>
    %c0_46 = arith.constant 0 : index
    %c7_47 = arith.constant 7 : index
    %110 = arith.index_cast %5 : i32 to index
    %c0_48 = arith.constant 0 : index
    %111 = vector.load %arg3[%c0_46, %c7_47, %110, %c0_48] : memref<1x9x32x128xf32, #tpu.memory_space<vmem>>, vector<1x1x32x128xf32>
    %112 = vector.shape_cast %111 : vector<1x1x32x128xf32> to vector<32x128xf32>
    %c7_i32 = arith.constant 7 : i32
    %113 = vector.broadcast %c7_i32 : i32 to vector<32x128xi32>
    %114 = arith.cmpi eq, %9, %113 : vector<32x128xi32>
    %115 = arith.subf %112, %44 : vector<32x128xf32>
    %116 = math.exp %115 : vector<32x128xf32>
    %117 = arith.addf %108, %116 : vector<32x128xf32>
    %118 = arith.select %114, %112, %109 : vector<32x128xi1>, vector<32x128xf32>
    %c0_49 = arith.constant 0 : index
    %c8_50 = arith.constant 8 : index
    %119 = arith.index_cast %5 : i32 to index
    %c0_51 = arith.constant 0 : index
    %120 = vector.load %arg3[%c0_49, %c8_50, %119, %c0_51] : memref<1x9x32x128xf32, #tpu.memory_space<vmem>>, vector<1x1x32x128xf32>
    %121 = vector.shape_cast %120 : vector<1x1x32x128xf32> to vector<32x128xf32>
    %c8_i32 = arith.constant 8 : i32
    %122 = vector.broadcast %c8_i32 : i32 to vector<32x128xi32>
    %123 = arith.cmpi eq, %9, %122 : vector<32x128xi32>
    %124 = arith.subf %121, %44 : vector<32x128xf32>
    %125 = math.exp %124 : vector<32x128xf32>
    %126 = arith.addf %117, %125 : vector<32x128xf32>
    %127 = arith.select %123, %121, %118 : vector<32x128xi1>, vector<32x128xf32>
    %128 = math.log %126 : vector<32x128xf32>
    %129 = arith.addf %128, %44 : vector<32x128xf32>
    %130 = arith.subf %127, %129 : vector<32x128xf32>
    %131 = math.exp %130 : vector<32x128xf32>
    %cst_52 = arith.constant 1.000000e+00 : f32
    %132 = vector.broadcast %cst_52 : f32 to vector<32x128xf32>
    %133 = arith.subf %132, %131 : vector<32x128xf32>
    %134 = arith.mulf %133, %133 : vector<32x128xf32>
    %cst_53 = arith.constant 1.000000e+00 : f32
    %135 = vector.broadcast %cst_53 : f32 to vector<32x128xf32>
    %136 = arith.mulf %135, %134 : vector<32x128xf32>
    %cst_54 = arith.constant 0.000000e+00 : f32
    %137 = vector.broadcast %cst_54 : f32 to vector<32x128xf32>
    %138 = arith.subf %137, %130 : vector<32x128xf32>
    %139 = arith.mulf %136, %138 : vector<32x128xf32>
    %c-1_i32 = arith.constant -1 : i32
    %140 = vector.broadcast %c-1_i32 : i32 to vector<32x128xi32>
    %141 = arith.cmpi ne, %9, %140 : vector<32x128xi32>
    %cst_55 = arith.constant 0.000000e+00 : f32
    %142 = vector.broadcast %cst_55 : f32 to vector<32x128xf32>
    %143 = arith.select %141, %139, %142 : vector<32x128xi1>, vector<32x128xf32>
    %144 = vector.shape_cast %143 : vector<32x128xf32> to vector<4x8x128xf32>
    %cst_56 = arith.constant dense<0.000000e+00> : vector<8x128xf32>
    %145 = vector.multi_reduction <add>, %144, %cst_56 [0] : vector<4x8x128xf32> to vector<8x128xf32>
    %146 = arith.addf %3, %145 : vector<8x128xf32>
    %c1_i32_57 = arith.constant 1 : i32
    %c0_58 = arith.constant 0 : index
    %c0_59 = arith.constant 0 : index
    %c0_60 = arith.constant 0 : index
    %c0_61 = arith.constant 0 : index
    %147 = vector.load %arg5[%c0_58, %c0_59, %c0_60, %c0_61] : memref<1x1x8x128xf32, #tpu.memory_space<vmem>>, vector<1x1x8x128xf32>
    %148 = vector.shape_cast %146 : vector<8x128xf32> to vector<1x1x8x128xf32>
    %149 = arith.addf %147, %148 : vector<1x1x8x128xf32>
    %c0_62 = arith.constant 0 : index
    %c0_63 = arith.constant 0 : index
    %c0_64 = arith.constant 0 : index
    %c0_65 = arith.constant 0 : index
    %150 = vector.load %arg5[%c0_62, %c0_63, %c0_64, %c0_65] : memref<1x1x8x128xf32, #tpu.memory_space<vmem>>, vector<1x1x8x128xf32>
    tpu.vector_store %arg5[%c0_62, %c0_63, %c0_64, %c0_65], %149 {strides = array<i32>} : memref<1x1x8x128xf32, #tpu.memory_space<vmem>>, vector<1x1x8x128xf32>,
    return
  }
  func.func @transform_0(%arg0: i32, %arg1: i32, %arg2: i32) -> (i32, i32, i32, i32) {
    %c1_i32 = arith.constant 1 : i32
    %0 = arith.muli %arg0, %c1_i32 : i32
    %1 = arith.addi %0, %arg2 : i32
    %c0_i32 = arith.constant 0 : i32
    %c0_i32_0 = arith.constant 0 : i32
    %c0_i32_1 = arith.constant 0 : i32
    return %arg1, %c0_i32, %1, %c0_i32_0 : i32, i32, i32, i32
  }
  func.func @transform_1(%arg0: i32, %arg1: i32, %arg2: i32) -> (i32, i32, i32) {
    %c1_i32 = arith.constant 1 : i32
    %0 = arith.muli %arg0, %c1_i32 : i32
    %1 = arith.addi %0, %arg2 : i32
    %c0_i32 = arith.constant 0 : i32
    %c0_i32_0 = arith.constant 0 : i32
    return %arg1, %1, %c0_i32 : i32, i32, i32
  }
  func.func @transform_2(%arg0: i32, %arg1: i32, %arg2: i32) -> (i32, i32, i32, i32) {
    %c0_i32 = arith.constant 0 : i32
    %c0_i32_0 = arith.constant 0 : i32
    %c0_i32_1 = arith.constant 0 : i32
    return %arg0, %arg1, %c0_i32, %c0_i32_0 : i32, i32, i32, i32
  }
}

</mosaic_0001>

<bundles_post_ra>
// kernel: tpu_custom_call.1
= control target key start
LH: loop header
LB: loop body
LE: loop exit
PB: predicated region body
PF: predicated region fallthrough
CT: control target
= control target key end

     0   :  { %7 = vsyncpa [#allocation3], 0  ;;  %s1605_s0 = inlined_call_operand.hbm [shape: f32[2,9,2,128], index: 0, kind: input, shape index: {}]   ;;  %s1606_s1 = inlined_call_operand.hbm [shape: s8[2,32,128], index: 1, kind: input, shape index: {}]   ;;  %s1607_s2 = inlined_call_operand.hbm [shape: f32[1,2,8,128], index: 2, kind: output, shape index: {}]  }
   0x1   :  { %9 = vsyncpa [#allocation3 + $0x1], 0 }
   0x2   :  { %10 = vsyncpa [#allocation6], 0 }
   0x3   :  { %12 = vsyncpa [#allocation6 + $0x1], 0 }
   0x4   :  { %13 = vsyncpa [#allocation4], 0 }
   0x5   :  { %15 = vsyncpa [#allocation4 + $0x1], 0  ;;  %s1110_s9 = smov 0   ;;  %s1112_s10 = smov 0  }
   0x6   :  { %s1114_s11 = smov 0   ;;  %s1116_s12 = smov 0  }
   0x7   :  { %s1118_s13 = smov 0   ;;  %s1120_s14 = smov 0  }
   0x8 LB: > { %s769_s15 = sadd.s32 4294967295, %s1086_s14   ;;  %s770_s16 = sadd.s32 4294967294, %s1086_s14   ;;  %s1086_s14 = sphi %s1120_s14, %s21_s14   ;;  %s1082_s13 = sphi %s1118_s13, %s1644_s13   ;;  %s1078_s12 = sphi %s1116_s12, %s1643_s12   ;;  %s1074_s11 = sphi %s1114_s11, %s1642_s11   ;;  %s1070_s10 = sphi %s1112_s10, %s1641_s10   ;;  %s1066_s9 = sphi %s1110_s9, %s1640_s9  }
   0x9   : > { %s36_s17 = sadd.s32 1, %s1082_s13  ;;  %s51_s18 = sadd.s32 1, %s1074_s11 }
   0xa   : > { %p38_p0 = scmp.ge.s32.totalorder %s36_s17, 2  ;;  %p58_p1 = scmp.ne.s32.totalorder %s1074_s11, %s1070_s10 }
   0xb   : > { %p59_p2 = scmp.eq.s32.totalorder %s1086_s14, 0  ;;  %p64_p3 = scmp.ne.s32.totalorder %s1070_s10, %s1066_s9 }
   0xc   : > { %s1646_s17 = smov (%p38_p0, %s36_s17), 0  ;;  %p65_p5 = scmp.eq.s32.totalorder %s769_s15, 0 }
   0xd   : > { %p1151_p4 = por %p59_p2, %p58_p1  ;;  %s46_s20 = ssub.s32 %s1082_s13, %s1646_s17 }
   0xe   : > { %p120_p6 = scmp.eq.s32.totalorder %s769_s15, 1  ;;  %p49_p7 = scmp.eq.s32.totalorder %s46_s20, 0 }
   0xf   : > { %p1157_p8 = por %p65_p5, %p64_p3  ;;  %p126_p10 = scmp.eq.s32.totalorder %s770_s16, 1 }
  0x10   : > { %p1161_p9 = por %p120_p6, %p58_p1  ;;  %p1608_p12 = scmp.ge.s32.totalorder %s1086_s14, 2 }
  0x11   : > { %s1619_s21 = scalar_select %p1157_p8, 1, 0 }
  0x12   : > { %s1620_s22 = scalar_select %p1161_p9, 1, 0 }
  0x13   : > { %s1166_s23 = scalar_select %p49_p7, %s1074_s11, %s51_s18  }
  0x14   : > { %p1168_p11 = por %p126_p10, %p64_p3  ;;  %142 = sbr.rel (%p1608_p12) target bundleno = 73 (0x49), region = 16 }
  0x16   : > { %s1621_s24 = scalar_select %p1168_p11, 1, 0 }
  0x1b   : > { %145 = sbr.rel (!%p1151_p4) target bundleno = 48 (0x30), region = 20 }
  0x22   : > { %s146_s25 = sand.u32 1, %s1074_s11  }
  0x23   : > { %s817_s26 = smul.u32 288, %s146_s25  ;;  %s147_s27 = scalar_lea.sflag [#allocation3], %s146_s25 }
  0x25   : > { %s150_s28 = scalar_lea.vmem [#allocation2], %s817_s26 }
  0x26   : > { %157 = vsyncadd %s147_s27, 4320  ;;  %s818_s29 = smul.u32 288, %s1082_s13  ;;  %s169_s30 = sld [smem:[#allocation0]]  }
  0x27   : > { %s177_s3 = sshll.u32 %s150_s28, 4  ;;  %s1088_s7 = smov 32   ;;  %s178_s3 = int_to_ptr.vmem [resolvable:$true] %s177_s3 }
  0x28   : > { %s162_s6 = scalar_lea.hbm %s1605_s0, %s818_s29  ;;  %184 = sst [smem:[#allocation9]] %s1088_s7 }
  0x29   : > { %s1089_s8 = smov 512   ;;  %s1090_s15 = smov 1  }
  0x2a   : > { %186 = sst [smem:[#allocation9 + $0x1]] %s1089_s8  ;;  %s1091_s20 = smov 2  }
  0x2b   : > { %188 = sst [smem:[#allocation9 + $0x2]] %s1090_s15  ;;  %s1092_s25 = smov [#allocation8]  }
  0x2c   : > { %s774_s16 = sshll.u32 %s169_s30, 26  ;;  %190 = sst [smem:[#allocation9 + $0x3]] %s1088_s7 }
  0x2d   : > { %s775_s18 = sadd.s32 134217728, %s774_s16  ;;  %192 = sst [smem:[#allocation9 + $0x4]] %s1088_s7 }
  0x2e   : > { %194 = sst [smem:[#allocation9 + $0x5]] %s1091_s20 }
  0x2f   : > { %196 = dma.general %s162_s6, 288, %s178_s3, %s147_s27, %s1092_s25, [#allocation9], %s775_s18, 0  }
  0x30 PF: > { %s200_s26 = sand.u32 1, %s1074_s11   ;;  %s777_s28 = sshll.u32 %s1082_s13, 7 }
  0x31   : > { %s776_s29 = sshll.u32 %s200_s26, 3  ;;  %s1187_s8 = scalar_lea.hbm %s1606_s1, %s777_s28 }
  0x32   : > { %s204_s30 = scalar_lea.vmem [#allocation5], %s776_s29  ;;  %s201_s27 = scalar_lea.sflag [#allocation6], %s200_s26 }
  0x33   : > { %s213_s7 = sshll.u32 %s204_s30, 4  ;;  %s972_s3 = scalar_lea.hbm %s1187_s8, 128  ;;  %s214_s7 = int_to_ptr.vmem [resolvable:$true] %s213_s7 }
  0x34   : > { %p973_p13 = scmp.ne.s32.totalorder %s1187_s8, %s972_s3  ;;  %s976_s16 = scalar_lea.hbm %s1606_s1, 256 }
  0x35   : > { %p977_p2 = scmp.lt.u32.totalorder %s1187_s8, %s1606_s1  ;;  %p978_p3 = scmp.lt.u32.totalorder %s976_s16, %s972_s3 }
  0x36   : > { %p974_p0 = pnand %p973_p13, %p1151_p4  ;;  %p980_p6 = scmp.lt.u32.totalorder %s972_s3, %s1187_s8 }
  0x37   : > { %p979_p5 = por %p978_p3, %p977_p2 }
  0x38   : > { %p975_p1 = pneg %p974_p0 }
  0x39   : > { %p981_p7 = por %p980_p6, %p979_p5 }
  0x3b   : > { %p982_p10 = pnand %p981_p7, %p975_p1 }
  0x3d   : > { %985 = shalt.err (!%p982_p10)
}
  0x3e   : > { %s986_s25 = scalar_lea.vmem %s214_s7, 128  ;;  %s1093_s26 = smov [#allocation5]  }
  0x3f   : > { %p987_p12 = scmp.ne.s32.totalorder %s214_s7, %s986_s25  ;;  %s990_s28 = sshll.u32 %s1093_s26, 4  ;;  %s991_s28 = int_to_ptr.vmem [resolvable:$false] %s990_s28 }
  0x40   : > { %s992_s29 = scalar_lea.vmem %s991_s28, 256  ;;  %p993_p11 = scmp.lt.s32.totalorder %s214_s7, %s991_s28 }
  0x41   : > { %p988_p13 = pnand %p987_p12, %p1151_p4  ;;  %p994_p9 = scmp.lt.s32.totalorder %s992_s29, %s986_s25 }
  0x43   : > { %p989_p0 = pneg %p988_p13  ;;  %p995_p8 = por %p994_p9, %p993_p11 }
  0x45   : > { %p996_p2 = pnand %p995_p8, %p989_p0 }
  0x47   : > { %999 = shalt.err (!%p996_p2)
}
  0x48   : > { %820 = dma.hbm_to_vmem [thread:$0]  (%p1151_p4), %s1187_s8, 128, %s214_s7, %s201_s27  }
  0x49 PF: > { %p778_p1 = scmp.ge.s32.totalorder %s1086_s14, 1  ;;  %p218_p3 = scmp.lt.s32.totalorder %s1086_s14, 3 }
  0x4b   : > { %p219_p12 = pnand %p778_p1, %p218_p3 }
  0x4d   : > { %222 = sbr.rel (%p219_p12) target bundleno = 217 (0xd9), region = 28 }
  0x54   : > { %s1209_s4 = sand.u32 1, %s1070_s10   ;;  %p1622_p8 = scmp.ne.s32.totalorder %s1619_s21, 0 }
  0x55   : > { %s819_s5 = smul.u32 288, %s1209_s4  ;;  %s225_s30 = scalar_lea.sflag [#allocation3], %s1209_s4 }
  0x57   : > { %s1213_s3 = scalar_lea.vmem [#allocation2], %s819_s5 }
  0x58   : > { %1053 = dma.done.wait (%p1622_p8), %s225_s30, 4608  }
  0x59   : > { %1055 = vsyncadd (%p1622_p8), %s225_s30, 4294962688  ;;  %s779_s19 = sshll.u32 %s1209_s4, 3  ;;  %s234_s8 = scalar_lea.sflag [#allocation6], %s1209_s4 }
  0x5a   : > { %s1223_s7 = scalar_lea.vmem [#allocation5], %s779_s19 }
  0x5b   : > { %1057 = dma.done.wait (%p1622_p8), %s234_s8, 128  }
  0x5c   : > { %1059 = vsyncadd (%p1622_p8), %s234_s8, 4294967168  ;;  %v1230_v0 = vld [vmem:[%s1213_s3] sm:$0xff]  ;;  %v1233_v1 = vld [vmem:[%s1213_s3 + $0x8] sm:$0xff]  ;;  %s814_s21 = sshll.u32 %s1078_s12, 7  ;;  %s262_s27 = scalar_lea.vmem [#allocation7], %s779_s19 }
  0x5d   : > { %v1236_v2 = vld [vmem:[%s1213_s3 + $0x10] sm:$0xff]  ;;  %v1239_v3 = vld [vmem:[%s1213_s3 + $0x18] sm:$0xff]  ;;  %v1242_v4 = vld [vmem:[%s1213_s3 + $0x20] sm:$0xff]  ;;  %s649_s6 = sshll.u32 %s262_s27, 4  ;;  %s1556_s18 = scalar_lea.hbm %s1607_s2, %s814_s21  ;;  %s1558_s6 = int_to_ptr.vmem [resolvable:$true] %s649_s6 }
  0x5e   : > { %v1245_v5 = vld [vmem:[%s1213_s3 + $0x28] sm:$0xff]  ;;  %v1248_v6 = vld [vmem:[%s1213_s3 + $0x30] sm:$0xff]  ;;  %v1251_v7 = vld [vmem:[%s1213_s3 + $0x38] sm:$0xff]  ;;  %v288_v8 = vmax.f32 %v1230_v0, %v1242_v4  ;;  %s634_s20 = scalar_lea.sflag [#allocation4], %s1209_s4  ;;  %s1000_s25 = scalar_lea.vmem %s1558_s6, 128 }
  0x5f   : > { %v289_v9 = vmax.f32 %v1233_v1, %v1245_v5  ;;  %v290_v10 = vmax.f32 %v1236_v2, %v1248_v6  ;;  %v291_v11 = vmax.f32 %v1239_v3, %v1251_v7  ;;  %v1262_v12 = vld [vmem:[%s1213_s3 + $0x40] sm:$0xff]  ;;  %v1265_v13 = vld [vmem:[%s1213_s3 + $0x48] sm:$0xff]  ;;  %v1268_v14 = vld [vmem:[%s1213_s3 + $0x50] sm:$0xff]  ;;  %p1001_p4 = scmp.ne.s32.totalorder %s1558_s6, %s1000_s25  ;;  %p1637_p9 = scmp.ne.s32.totalorder %s1620_s22, 0 }
  0x60   : > { %v1271_v15 = vld [vmem:[%s1213_s3 + $0x58] sm:$0xff]  ;;  %v298_v16 = vmax.f32 %v288_v8, %v1262_v12  ;;  %v1275_v17 = vld [vmem:[%s1213_s3 + $0x60] sm:$0xff]  ;;  %v1278_v18 = vld [vmem:[%s1213_s3 + $0x68] sm:$0xff]  ;;  %s1094_s12 = smov [#allocation7]  }
  0x61   : > { %v299_v19 = vmax.f32 %v289_v9, %v1265_v13  ;;  %v300_v20 = vmax.f32 %v290_v10, %v1268_v14  ;;  %v301_v21 = vmax.f32 %v291_v11, %v1271_v15  ;;  %v1284_v22 = vld [vmem:[%s1213_s3 + $0x70] sm:$0xff]  ;;  %v1287_v23 = vld [vmem:[%s1213_s3 + $0x78] sm:$0xff]  ;;  %v1290_v24 = vld [vmem:[%s1213_s3 + $0x80] sm:$0xff]  ;;  %p1002_p11 = pnand %p1001_p4, %p1637_p9  ;;  %s1004_s26 = sshll.u32 %s1094_s12, 4  ;;  %s1005_s26 = int_to_ptr.vmem [resolvable:$false] %s1004_s26 }
  0x62   : > { %v308_v25 = vmax.f32 %v298_v16, %v1275_v17  ;;  %v1294_v26 = vld [vmem:[%s1213_s3 + $0x88] sm:$0xff]  ;;  %v1297_v27 = vld [vmem:[%s1213_s3 + $0x90] sm:$0xff]  ;;  %v1300_v28 = vld [vmem:[%s1213_s3 + $0x98] sm:$0xff]  ;;  %s1006_s28 = scalar_lea.vmem %s1005_s26, 256  ;;  %p1007_p6 = scmp.lt.s32.totalorder %s1558_s6, %s1005_s26 }
  0x63   : > { %v309_v29 = vmax.f32 %v299_v19, %v1278_v18  ;;  %v310_v30 = vmax.f32 %v300_v20, %v1284_v22  ;;  %v311_v31 = vmax.f32 %v301_v21, %v1287_v23  ;;  %v1306_v32 = vld [vmem:[%s1213_s3 + $0xa0] sm:$0xff]  ;;  %v1310_v34 = vld [vmem:[%s1213_s3 + $0xa8] sm:$0xff]  ;;  %v1313_v35 = vld [vmem:[%s1213_s3 + $0xb0] sm:$0xff]  ;;  %p1003_p5 = pneg %p1002_p11  ;;  %p1008_p7 = scmp.lt.s32.totalorder %s1006_s28, %s1000_s25 }
  0x64   : > { %1623 = vst [vmem:[#allocation13_spill] sm:$0xff] %v1306_v32  ;;  %v318_v33 = vmax.f32 %v308_v25, %v1290_v24  ;;  %1624 = vst [vmem:[#allocation14_spill] sm:$0xff] %v1310_v34  ;;  %v1316_v36 = vld [vmem:[%s1213_s3 + $0xb8] sm:$0xff]  ;;  %v1322_v40 = vld [vmem:[%s1213_s3 + $0xc0] sm:$0xff] }
  0x65   : > { %1625 = vst [vmem:[#allocation15_spill] sm:$0xff] %v1313_v35  ;;  %1626 = vst [vmem:[#allocation16_spill] sm:$0xff] %v1316_v36  ;;  %v319_v37 = vmax.f32 %v309_v29, %v1294_v26  ;;  %v320_v38 = vmax.f32 %v310_v30, %v1297_v27  ;;  %v321_v39 = vmax.f32 %v311_v31, %v1300_v28  ;;  %v1326_v42 = vld [vmem:[%s1213_s3 + $0xc8] sm:$0xff]  ;;  %v1329_v43 = vld [vmem:[%s1213_s3 + $0xd0] sm:$0xff]  ;;  %p1009_p10 = por %p1008_p7, %p1007_p6 }
  0x66   : > { %1627 = vst [vmem:[#allocation17_spill] sm:$0xff] %v1322_v40  ;;  %v328_v41 = vmax.f32 %v318_v33, %v1306_v32  ;;  %1628 = vst [vmem:[#allocation18_spill] sm:$0xff] %v1326_v42  ;;  %v1332_v44 = vld [vmem:[%s1213_s3 + $0xd8] sm:$0xff]  ;;  %v1338_v48 = vld [vmem:[%s1213_s3 + $0xe0] sm:$0xff] }
  0x67   : > { %1629 = vst [vmem:[#allocation19_spill] sm:$0xff] %v1329_v43  ;;  %v329_v45 = vmax.f32 %v319_v37, %v1310_v34  ;;  %v330_v46 = vmax.f32 %v320_v38, %v1313_v35  ;;  %v331_v47 = vmax.f32 %v321_v39, %v1316_v36  ;;  %v1342_v50 = vld [vmem:[%s1213_s3 + $0xe8] sm:$0xff]  ;;  %v1345_v51 = vld [vmem:[%s1213_s3 + $0xf0] sm:$0xff]  ;;  %v1348_v52 = vld [vmem:[%s1213_s3 + $0xf8] sm:$0xff]  ;;  %p1010_p13 = pnand %p1009_p10, %p1003_p5 }
  0x68   : > { %v338_v49 = vmax.f32 %v328_v41, %v1322_v40  ;;  %v1354_v56 = vld [vmem:[%s1213_s3 + $0x100] sm:$0xff]  ;;  %v1358_v58 = vld [vmem:[%s1213_s3 + $0x108] sm:$0xff]  ;;  %v1361_v59 = vld [vmem:[%s1213_s3 + $0x110] sm:$0xff] }
  0x69   : > { %v339_v53 = vmax.f32 %v329_v45, %v1326_v42  ;;  %v340_v54 = vmax.f32 %v330_v46, %v1329_v43  ;;  %v341_v55 = vmax.f32 %v331_v47, %v1332_v44  ;;  %v1364_v60 = vld [vmem:[%s1213_s3 + $0x118] sm:$0xff] }
  0x6a   : > { %v348_v57 = vmax.f32 %v338_v49, %v1338_v48 }
  0x6b   : > { %v349_v61 = vmax.f32 %v339_v53, %v1342_v50  ;;  %v350_v62 = vmax.f32 %v340_v54, %v1345_v51  ;;  %v351_v63 = vmax.f32 %v341_v55, %v1348_v52 }
  0x6c   : > { %v1370_v8 = vmax.f32 %v348_v57, %v1354_v56 }
  0x6d   : > { %v1373_v9 = vmax.f32 %v349_v61, %v1358_v58  ;;  %v1376_v10 = vmax.f32 %v350_v62, %v1361_v59  ;;  %v1379_v11 = vmax.f32 %v351_v63, %v1364_v60 }
  0x6e   : > { %v366_v16 = vsub.f32 %v1230_v0, %v1370_v8  ;;  %v390_v29 = vsub.f32 %v1242_v4, %v1370_v8  ;;  %v414_v45 = vsub.f32 %v1262_v12, %v1370_v8  ;;  %v438_v61 = vsub.f32 %v1275_v17, %v1370_v8 }
  0x6f   : > { %v367_v19 = vsub.f32 %v1233_v1, %v1373_v9  ;;  %v368_v20 = vsub.f32 %v1236_v2, %v1376_v10  ;;  %v369_v21 = vsub.f32 %v1239_v3, %v1379_v11  ;;  %v391_v31 = vsub.f32 %v1245_v5, %v1373_v9 }
  0x70   : > { %v370_v25 = vmul.f32 1.442695, %v366_v16  ;;  %v392_v37 = vsub.f32 %v1248_v6, %v1376_v10  ;;  %v393_v39 = vsub.f32 %v1251_v7, %v1379_v11  ;;  %v394_v41 = vmul.f32 1.442695, %v390_v29 }
  0x71   : > { %v372_v30 = vmul.f32 1.442695, %v367_v19  ;;  %v374_v33 = vmul.f32 1.442695, %v368_v20  ;;  %v376_v38 = vmul.f32 1.442695, %v369_v21  ;;  %v415_v47 = vsub.f32 %v1265_v13, %v1373_v9 }
  0x72   : > { %884 = vpow2.f32 %v370_v25  ;;  %v396_v46 = vmul.f32 1.442695, %v391_v31  ;;  %v398_v49 = vmul.f32 1.442695, %v392_v37  ;;  %v416_v53 = vsub.f32 %v1268_v14, %v1376_v10 }
  0x73   : > { %886 = vpow2.f32 %v372_v30  ;;  %v400_v54 = vmul.f32 1.442695, %v393_v39  ;;  %v417_v55 = vsub.f32 %v1271_v15, %v1379_v11  ;;  %v418_v57 = vmul.f32 1.442695, %v414_v45 }
  0x74   : > { %888 = vpow2.f32 %v374_v33  ;;  %v420_v62 = vmul.f32 1.442695, %v415_v47  ;;  %v439_v63 = vsub.f32 %v1278_v18, %v1373_v9  ;;  %v422_v16 = vmul.f32 1.442695, %v416_v53 }
  0x75   : > { %890 = vpow2.f32 %v376_v38  ;;  %v424_v19 = vmul.f32 1.442695, %v417_v55  ;;  %v440_v20 = vsub.f32 %v1284_v22, %v1376_v10  ;;  %v441_v21 = vsub.f32 %v1287_v23, %v1379_v11 }
  0x76   : > { %892 = vpow2.f32 %v394_v41  ;;  %v442_v25 = vmul.f32 1.442695, %v438_v61  ;;  %v444_v29 = vmul.f32 1.442695, %v439_v63  ;;  %v462_v30 = vsub.f32 %v1290_v24, %v1370_v8 }
  0x77   : > { %894 = vpow2.f32 %v396_v46  ;;  %v463_v33 = vsub.f32 %v1294_v26, %v1373_v9  ;;  %v446_v38 = vmul.f32 1.442695, %v440_v20  ;;  %v464_v39 = vsub.f32 %v1297_v27, %v1376_v10 }
  0x78   : > { %896 = vpow2.f32 %v398_v49  ;;  %v448_v45 = vmul.f32 1.442695, %v441_v21  ;;  %v465_v46 = vsub.f32 %v1300_v28, %v1379_v11  ;;  %v466_v49 = vmul.f32 1.442695, %v462_v30 }
  0x79   : > { %898 = vpow2.f32 %v400_v54  ;;  %v486_v53 = vsub.f32 %v1306_v32, %v1370_v8  ;;  %v468_v55 = vmul.f32 1.442695, %v463_v33  ;;  %v488_v63 = vsub.f32 %v1313_v35, %v1376_v10 }
  0x7a   : > { %900 = vpow2.f32 %v418_v57  ;;  %v487_v57 = vsub.f32 %v1310_v34, %v1373_v9  ;;  %v472_v20 = vmul.f32 1.442695, %v465_v46  ;;  %v510_v30 = vsub.f32 %v1322_v40, %v1370_v8  ;;  %v273_v34 = vld [vmem:[%s1223_s7] sm:$0xff] }
  0x7b   : > { %902 = vpow2.f32 %v420_v62  ;;  %v470_v62 = vmul.f32 1.442695, %v464_v39  ;;  %v511_v35 = vsub.f32 %v1326_v42, %v1373_v9  ;;  %v1440_v40 = vunpack.c.1.s8 %v273_v34 }
  0x7c   : > { %v885_v31 = vpop.eup %884  ;;  %904 = vpow2.f32 %v422_v16  ;;  %v489_v16 = vsub.f32 %v1316_v36, %v1379_v11  ;;  %v492_v39 = vmul.f32 1.442695, %v487_v57  ;;  %v494_v36 = vmul.f32 1.442695, %v488_v63 }
  0x7d   : > { %v887_v37 = vpop.eup %886  ;;  %906 = vpow2.f32 %v424_v19  ;;  %v514_v57 = vmul.f32 1.442695, %v510_v30  ;;  %v516_v63 = vmul.f32 1.442695, %v511_v35  ;;  %v536_v35 = vsub.f32 %v1345_v51, %v1376_v10 }
  0x7e   : > { %v889_v41 = vpop.eup %888  ;;  %908 = vpow2.f32 %v442_v25  ;;  %vm363_vm1 = vcmp.eq.s32.totalorder %v1440_v40, 0  ;;  %vm387_vm5 = vcmp.eq.s32.totalorder %v1440_v40, 1  ;;  %vm411_vm9 = vcmp.eq.s32.totalorder %v1440_v40, 2 }
  0x7f   : > { %v891_v47 = vpop.eup %890  ;;  %910 = vpow2.f32 %v444_v29  ;;  %v490_v29 = vmul.f32 1.442695, %v486_v53  ;;  %vm435_vm13 = vcmp.eq.s32.totalorder %v1440_v40, 3 }
  0x80   : > { %v893_v54 = vpop.eup %892  ;;  %912 = vpow2.f32 %v446_v38 }
  0x81   : > { %v895_v61 = vpop.eup %894  ;;  %914 = vpow2.f32 %v448_v45  ;;  %v402_v25 = vadd.f32 %v893_v54, %v885_v31  ;;  %v496_v45 = vmul.f32 1.442695, %v489_v16  ;;  %v512_v31 = vsub.f32 %v1329_v43, %v1376_v10 }
  0x82   : > { %v897_v19 = vpop.eup %896  ;;  %916 = vpow2.f32 %v466_v49  ;;  %v403_v38 = vadd.f32 %v895_v61, %v887_v37  ;;  %v513_v54 = vsub.f32 %v1332_v44, %v1379_v11  ;;  %v1442_v43 = vunpack.c.2.s8 %v273_v34 }
  0x83   : > { %v899_v21 = vpop.eup %898  ;;  %918 = vpow2.f32 %v468_v55  ;;  %v404_v49 = vadd.f32 %v897_v19, %v889_v41  ;;  %v1438_v55 = vunpack.c.0.s8 %v273_v34  ;;  %v518_v41 = vmul.f32 1.442695, %v512_v31 }
  0x84   : > { %v901_v33 = vpop.eup %900  ;;  %920 = vpow2.f32 %v470_v62  ;;  %v405_v53 = vadd.f32 %v899_v21, %v891_v47  ;;  %v542_v31 = vmul.f32 1.442695, %v536_v35  ;;  %vm364_vm2 = vcmp.eq.s32.totalorder %v1442_v43, 0 }
  0x85   : > { %v903_v32 = vpop.eup %902  ;;  %922 = vpow2.f32 %v472_v20  ;;  %v426_v42 = vadd.f32 %v901_v33, %v402_v25  ;;  %v520_v20 = vmul.f32 1.442695, %v513_v54  ;;  %vm362_vm0 = vcmp.eq.s32.totalorder %v1438_v55, 0 }
  0x86   : > { %v905_v46 = vpop.eup %904  ;;  %924 = vpow2.f32 %v490_v29  ;;  %v427_v62 = vadd.f32 %v903_v32, %v403_v38  ;;  %v534_v29 = vsub.f32 %v1338_v48, %v1370_v8  ;;  %v535_v32 = vsub.f32 %v1342_v50, %v1373_v9 }
  0x87   : > { %v907_v37 = vpop.eup %906  ;;  %926 = vpow2.f32 %v492_v39  ;;  %v428_v47 = vadd.f32 %v905_v46, %v404_v49  ;;  %vm386_vm4 = vcmp.eq.s32.totalorder %v1438_v55, 1  ;;  %vm388_vm6 = vcmp.eq.s32.totalorder %v1442_v43, 1 }
  0x88   : > { %v909_v61 = vpop.eup %908  ;;  %928 = vpow2.f32 %v494_v36  ;;  %v429_v19 = vadd.f32 %v907_v37, %v405_v53  ;;  %v537_v36 = vsub.f32 %v1348_v52, %v1379_v11  ;;  %v538_v39 = vmul.f32 1.442695, %v534_v29 }
  0x89   : > { %v911_v16 = vpop.eup %910  ;;  %930 = vpow2.f32 %v496_v45  ;;  %v450_v30 = vadd.f32 %v909_v61, %v426_v42  ;;  %v540_v45 = vmul.f32 1.442695, %v535_v32  ;;  %v1452_v37 = vunpack.c.3.s8 %v273_v34 }
  0x8a   : > { %v913_v21 = vpop.eup %912  ;;  %932 = vpow2.f32 %v514_v57  ;;  %v451_v33 = vadd.f32 %v911_v16, %v427_v62  ;;  %v544_v53 = vmul.f32 1.442695, %v537_v36  ;;  %v558_v16 = vsub.f32 %v1354_v56, %v1370_v8 }
  0x8b   : > { %v915_v25 = vpop.eup %914  ;;  %934 = vpow2.f32 %v516_v63  ;;  %v452_v49 = vadd.f32 %v913_v21, %v428_v47  ;;  %v559_v34 = vsub.f32 %v1358_v58, %v1373_v9  ;;  %vm365_vm3 = vcmp.eq.s32.totalorder %v1452_v37, 0 }
  0x8c   : > { %v917_v38 = vpop.eup %916  ;;  %936 = vpow2.f32 %v518_v41  ;;  %v453_v42 = vadd.f32 %v915_v25, %v429_v19  ;;  %v560_v19 = vsub.f32 %v1361_v59, %v1376_v10  ;;  %v562_v32 = vmul.f32 1.442695, %v558_v16 }
  0x8d   : > { %v919_v46 = vpop.eup %918  ;;  %938 = vpow2.f32 %v520_v20  ;;  %v474_v61 = vadd.f32 %v917_v38, %v450_v30  ;;  %v561_v20 = vsub.f32 %v1364_v60, %v1379_v11  ;;  %v564_v35 = vmul.f32 1.442695, %v559_v34 }
  0x8e   : > { %v921_v54 = vpop.eup %920  ;;  %940 = vpow2.f32 %v538_v39  ;;  %v475_v63 = vadd.f32 %v919_v46, %v451_v33  ;;  %v382_v30 = vsel %vm362_vm0, %v1230_v0, 0.0  ;;  %v566_v36 = vmul.f32 1.442695, %v560_v19 }
  0x8f   : > { %v923_v57 = vpop.eup %922  ;;  %942 = vpow2.f32 %v540_v45  ;;  %v476_v47 = vadd.f32 %v921_v54, %v452_v49  ;;  %v568_v38 = vmul.f32 1.442695, %v561_v20  ;;  %v383_v45 = vsel %vm363_vm1, %v1233_v1, 0.0 }
  0x90   : > { %v925_v62 = vpop.eup %924  ;;  %944 = vpow2.f32 %v542_v31  ;;  %v477_v29 = vadd.f32 %v923_v57, %v453_v42  ;;  %v384_v49 = vsel %vm364_vm2, %v1236_v2, 0.0  ;;  %v385_v54 = vsel %vm365_vm3, %v1239_v3, 0.0 }
  0x91   : > { %v927_v41 = vpop.eup %926  ;;  %946 = vpow2.f32 %v544_v53  ;;  %v498_v33 = vadd.f32 %v925_v62, %v474_v61  ;;  %vm389_vm7 = vcmp.eq.s32.totalorder %v1452_v37, 1  ;;  %v406_v57 = vsel %vm386_vm4, %v1242_v4, %v382_v30 }
  0x92   : > { %v929_v21 = vpop.eup %928  ;;  %v499_v31 = vadd.f32 %v927_v41, %v475_v63  ;;  %948 = vpow2.f32 %v562_v32  ;;  %v407_v62 = vsel %vm387_vm5, %v1245_v5, %v383_v45  ;;  %vm410_vm8 = vcmp.eq.s32.totalorder %v1438_v55, 2 }
  0x93   : > { %v931_v25 = vpop.eup %930  ;;  %v500_v0 = vadd.f32 %v929_v21, %v476_v47  ;;  %950 = vpow2.f32 %v564_v35  ;;  %v408_v16 = vsel %vm388_vm6, %v1248_v6, %v384_v49  ;;  %vm412_vm10 = vcmp.eq.s32.totalorder %v1442_v43, 2  ;;  %v1631_v49 = vld [vmem:[#allocation14_spill] sm:$0xff] }
  0x94   : > { %v933_v39 = vpop.eup %932  ;;  %v501_v1 = vadd.f32 %v931_v25, %v477_v29  ;;  %952 = vpow2.f32 %v566_v36  ;;  %v409_v47 = vsel %vm389_vm7, %v1251_v7, %v385_v54  ;;  %vm413_vm11 = vcmp.eq.s32.totalorder %v1452_v37, 2  ;;  %v1634_v54 = vld [vmem:[#allocation17_spill] sm:$0xff] }
  0x95   : > { %v935_v46 = vpop.eup %934  ;;  %v522_v61 = vadd.f32 %v933_v39, %v498_v33  ;;  %954 = vpow2.f32 %v568_v38  ;;  %v430_v5 = vsel %vm410_vm8, %v1262_v12, %v406_v57  ;;  %v431_v20 = vsel %vm411_vm9, %v1265_v13, %v407_v62 }
  0x96   : > { %v937_v53 = vpop.eup %936  ;;  %v523_v63 = vadd.f32 %v935_v46, %v499_v31  ;;  %vm434_vm12 = vcmp.eq.s32.totalorder %v1438_v55, 3  ;;  %v432_v29 = vsel %vm412_vm10, %v1268_v14, %v408_v16  ;;  %vm436_vm14 = vcmp.eq.s32.totalorder %v1442_v43, 3 }
  0x97   : > { %v939_v42 = vpop.eup %938  ;;  %v524_v34 = vadd.f32 %v937_v53, %v500_v0  ;;  %v433_v7 = vsel %vm413_vm11, %v1271_v15, %v409_v47  ;;  %vm437_vm15 = vcmp.eq.s32.totalorder %v1452_v37, 3  ;;  %v454_v12 = vsel %vm434_vm12, %v1275_v17, %v430_v5  ;;  %v1632_v0 = vld [vmem:[#allocation15_spill] sm:$0xff] }
  0x98   : > { %v941_v2 = vpop.eup %940  ;;  %v525_v4 = vadd.f32 %v939_v42, %v501_v1  ;;  %vm458_vm0 = vcmp.eq.s32.totalorder %v1438_v55, 4  ;;  %v455_v30 = vsel %vm435_vm13, %v1278_v18, %v431_v20  ;;  %v456_v14 = vsel %vm436_vm14, %v1284_v22, %v432_v29  ;;  %v1635_v42 = vld [vmem:[#allocation18_spill] sm:$0xff] }
  0x99   : > { %v943_v3 = vpop.eup %942  ;;  %v546_v21 = vadd.f32 %v941_v2, %v522_v61  ;;  %vm459_vm1 = vcmp.eq.s32.totalorder %v1440_v40, 4  ;;  %v457_v15 = vsel %vm437_vm15, %v1287_v23, %v433_v7  ;;  %vm460_vm2 = vcmp.eq.s32.totalorder %v1442_v43, 4  ;;  %v1636_v61 = vld [vmem:[#allocation19_spill] sm:$0xff] }
  0x9a   : > { %v945_v41 = vpop.eup %944  ;;  %v547_v6 = vadd.f32 %v943_v3, %v523_v63  ;;  %vm461_vm3 = vcmp.eq.s32.totalorder %v1452_v37, 4  ;;  %v478_v39 = vsel %vm458_vm0, %v1290_v24, %v454_v12  ;;  %vm482_vm4 = vcmp.eq.s32.totalorder %v1438_v55, 5  ;;  %v1630_v24 = vld [vmem:[#allocation13_spill] sm:$0xff] }
  0x9b   : > { %v947_v19 = vpop.eup %946  ;;  %v548_v32 = vadd.f32 %v945_v41, %v524_v34  ;;  %v479_v18 = vsel %vm459_vm1, %v1294_v26, %v455_v30  ;;  %vm483_vm5 = vcmp.eq.s32.totalorder %v1440_v40, 5  ;;  %v480_v23 = vsel %vm460_vm2, %v1297_v27, %v456_v14  ;;  %v1633_v27 = vld [vmem:[#allocation16_spill] sm:$0xff] }
  0x9c   : > { %v949_v35 = vpop.eup %948  ;;  %v549_v13 = vadd.f32 %v947_v19, %v525_v4  ;;  %v481_v31 = vsel %vm461_vm3, %v1300_v28, %v457_v15  ;;  %vm484_vm6 = vcmp.eq.s32.totalorder %v1442_v43, 5  ;;  %vm485_vm7 = vcmp.eq.s32.totalorder %v1452_v37, 5 }
  0x9d   : > { %v951_v25 = vpop.eup %950  ;;  %v570_v33 = vadd.f32 %v949_v35, %v546_v21  ;;  %v502_v46 = vsel %vm482_vm4, %v1630_v24, %v478_v39  ;;  %vm506_vm8 = vcmp.eq.s32.totalorder %v1438_v55, 6  ;;  %v503_v26 = vsel %vm483_vm5, %v1631_v49, %v479_v18 }
  0x9e   : > { %v953_v36 = vpop.eup %952  ;;  %v571_v38 = vadd.f32 %v951_v25, %v547_v6  ;;  %vm507_vm9 = vcmp.eq.s32.totalorder %v1440_v40, 6  ;;  %v504_v53 = vsel %vm484_vm6, %v1632_v0, %v480_v23  ;;  %vm508_vm10 = vcmp.eq.s32.totalorder %v1442_v43, 6 }
  0x9f   : > { %v955_v17 = vpop.eup %954  ;;  %v572_v45 = vadd.f32 %v953_v36, %v548_v32  ;;  %956 = vlog2.f32 %v570_v33  ;;  %v505_v28 = vsel %vm485_vm7, %v1633_v27, %v481_v31  ;;  %vm509_vm11 = vcmp.eq.s32.totalorder %v1452_v37, 6 }
  0xa0   : > { %v573_v22 = vadd.f32 %v955_v17, %v549_v13  ;;  %958 = vlog2.f32 %v571_v38  ;;  %v526_v1 = vsel %vm506_vm8, %v1634_v54, %v502_v46  ;;  %vm530_vm12 = vcmp.eq.s32.totalorder %v1438_v55, 7 }
  0xa1   : > { %960 = vlog2.f32 %v572_v45  ;;  %v527_v57 = vsel %vm507_vm9, %v1635_v42, %v503_v26  ;;  %vm531_vm13 = vcmp.eq.s32.totalorder %v1440_v40, 7  ;;  %v528_v2 = vsel %vm508_vm10, %v1636_v61, %v504_v53 }
  0xa2   : > { %962 = vlog2.f32 %v573_v22  ;;  %vm532_vm14 = vcmp.eq.s32.totalorder %v1442_v43, 7  ;;  %v529_v62 = vsel %vm509_vm11, %v1332_v44, %v505_v28  ;;  %vm533_vm15 = vcmp.eq.s32.totalorder %v1452_v37, 7 }
  0xa3   : > { %v550_v63 = vsel %vm530_vm12, %v1338_v48, %v526_v1  ;;  %vm554_vm0 = vcmp.eq.s32.totalorder %v1438_v55, 8  ;;  %v551_v16 = vsel %vm531_vm13, %v1342_v50, %v527_v57  ;;  %vm555_vm1 = vcmp.eq.s32.totalorder %v1440_v40, 8 }
  0xa4   : > { %v552_v41 = vsel %vm532_vm14, %v1345_v51, %v528_v2  ;;  %vm556_vm2 = vcmp.eq.s32.totalorder %v1442_v43, 8  ;;  %v553_v44 = vsel %vm533_vm15, %v1348_v52, %v529_v62  ;;  %vm557_vm3 = vcmp.eq.s32.totalorder %v1452_v37, 8 }
  0xa5   : > { %v574_v48 = vsel %vm554_vm0, %v1354_v56, %v550_v63  ;;  %v575_v20 = vsel %vm555_vm1, %v1358_v58, %v551_v16  ;;  %v576_v29 = vsel %vm556_vm2, %v1361_v59, %v552_v41  ;;  %v577_v7 = vsel %vm557_vm3, %v1364_v60, %v553_v44 }
  0xa6   : > { %vm618_vm4 = vcmp.ne.s32.totalorder %v1438_v55, 4294967295  ;;  %vm619_vm5 = vcmp.ne.s32.totalorder %v1440_v40, 4294967295  ;;  %vm620_vm6 = vcmp.ne.s32.totalorder %v1442_v43, 4294967295  ;;  %vm621_vm7 = vcmp.ne.s32.totalorder %v1452_v37, 4294967295 }
  0xa9   : > { %v957_v3 = vpop.eup %956 }
  0xaa   : > { %v959_v34 = vpop.eup %958  ;;  %v579_v47 = vmul.f32 0.6931472, %v957_v3 }
  0xab   : > { %v961_v4 = vpop.eup %960  ;;  %v581_v19 = vmul.f32 0.6931472, %v959_v34 }
  0xac   : > { %v963_v5 = vpop.eup %962  ;;  %v583_v50 = vmul.f32 0.6931472, %v961_v4  ;;  %v586_v21 = vadd.f32 %v579_v47, %v1370_v8 }
  0xad   : > { %v585_v51 = vmul.f32 0.6931472, %v963_v5  ;;  %v587_v6 = vadd.f32 %v581_v19, %v1373_v9 }
  0xae   : > { %v588_v52 = vadd.f32 %v583_v50, %v1376_v10  ;;  %v590_v32 = vsub.f32 %v574_v48, %v586_v21 }
  0xaf   : > { %v589_v35 = vadd.f32 %v585_v51, %v1379_v11  ;;  %v591_v56 = vsub.f32 %v575_v20, %v587_v6 }
  0xb0   : > { %v592_v12 = vsub.f32 %v576_v29, %v588_v52  ;;  %v594_v13 = vmul.f32 1.442695, %v590_v32  ;;  %v610_v60 = vsub.f32 0.0, %v590_v32 }
  0xb1   : > { %v593_v25 = vsub.f32 %v577_v7, %v589_v35  ;;  %v596_v58 = vmul.f32 1.442695, %v591_v56  ;;  %v611_v36 = vsub.f32 0.0, %v591_v56 }
  0xb2   : > { %964 = vpow2.f32 %v594_v13  ;;  %v598_v30 = vmul.f32 1.442695, %v592_v12  ;;  %v612_v17 = vsub.f32 0.0, %v592_v12 }
  0xb3   : > { %966 = vpow2.f32 %v596_v58  ;;  %v600_v8 = vmul.f32 1.442695, %v593_v25  ;;  %v613_v18 = vsub.f32 0.0, %v593_v25 }
  0xb4   : > { %968 = vpow2.f32 %v598_v30 }
  0xb5   : > { %970 = vpow2.f32 %v600_v8 }
  0xbc   : > { %v965_v59 = vpop.eup %964 }
  0xbd   : > { %v967_v9 = vpop.eup %966  ;;  %v602_v14 = vsub.f32 1.0, %v965_v59 }
  0xbe   : > { %v969_v33 = vpop.eup %968  ;;  %v603_v10 = vsub.f32 1.0, %v967_v9 }
  0xbf   : > { %v971_v15 = vpop.eup %970  ;;  %v604_v11 = vsub.f32 1.0, %v969_v33  ;;  %v606_v38 = vmul.f32 %v602_v14, %v602_v14 }
  0xc0   : > { %v605_v39 = vsub.f32 1.0, %v971_v15  ;;  %v607_v45 = vmul.f32 %v603_v10, %v603_v10 }
  0xc1   : > { %v608_v22 = vmul.f32 %v604_v11, %v604_v11  ;;  %v614_v23 = vmul.f32 %v610_v60, %v606_v38 }
  0xc2   : > { %v609_v31 = vmul.f32 %v605_v39, %v605_v39  ;;  %v615_v24 = vmul.f32 %v611_v36, %v607_v45 }
  0xc3   : > { %v616_v46 = vmul.f32 %v612_v17, %v608_v22  ;;  %v622_v49 = vsel %vm618_vm4, %v614_v23, 0.0 }
  0xc4   : > { %v617_v26 = vmul.f32 %v613_v18, %v609_v31  ;;  %v623_v0 = vsel %vm619_vm5, %v615_v24, 0.0 }
  0xc5   : > { %v624_v53 = vsel %vm620_vm6, %v616_v46, 0.0  ;;  %v626_v55 = vadd.f32 %v623_v0, %v622_v49 }
  0xc6   : > { %v625_v27 = vsel %vm621_vm7, %v617_v26, 0.0 }
  0xc7   : > { %v627_v28 = vadd.f32 %v626_v55, %v624_v53 }
  0xc9   : > { %v628_v40 = vadd.f32 %v627_v28, %v625_v27 }
  0xcb   : > { %632 = vst [vmem:[%s262_s27] sm:$0xff] %v628_v40 }
  0xcc   : > { %1013 = shalt.err (!%p1010_p13)
}
  0xcd   : > { %s1014_s29 = scalar_lea.hbm %s1556_s18, 128  ;;  %s1018_s30 = scalar_lea.hbm %s1607_s2, 256 }
  0xce   : > { %p1015_p0 = scmp.ne.s32.totalorder %s1556_s18, %s1014_s29  ;;  %p1019_p3 = scmp.lt.u32.totalorder %s1556_s18, %s1607_s2 }
  0xcf   : > { %p1020_p12 = scmp.lt.u32.totalorder %s1018_s30, %s1014_s29  ;;  %p1022_p4 = scmp.lt.u32.totalorder %s1014_s29, %s1556_s18 }
  0xd0   : > { %p1016_p2 = pnand %p1015_p0, %p1637_p9 }
  0xd1   : > { %p1021_p8 = por %p1020_p12, %p1019_p3 }
  0xd2   : > { %p1017_p1 = pneg %p1016_p2 }
  0xd3   : > { %p1023_p11 = por %p1022_p4, %p1021_p8 }
  0xd5   : > { %p1024_p5 = pnand %p1023_p11, %p1017_p1 }
  0xd7   : > { %1027 = shalt.err (!%p1024_p5)
}
  0xd8   : > { %823 = dma.vmem_to_hbm [thread:$0]  (%p1637_p9), %s1558_s6, 128, %s1556_s18, %s634_s20  }
  0xd9 PF: > { %s661_s8 = sand.u32 1, %s1066_s9   ;;  %p1638_p6 = scmp.ne.s32.totalorder %s1621_s24, 0 }
  0xda   : > { %p1639_p7 = scmp.ge.s32.totalorder %s1086_s14, 2  ;;  %s662_s7 = scalar_lea.sflag [#allocation4], %s661_s8 }
  0xdc   : > { %p826_p10 = pnand %p1639_p7, %p1638_p6 }
  0xde   : > { %1061 = dma.done.wait (!%p826_p10), %s662_s7, 128  }
  0xdf   : > { %1063 = vsyncadd (!%p826_p10), %s662_s7, 4294967168  ;;  %s21_s14 = sadd.s32 1, %s1086_s14   ;;  %s1640_s9 = smov %s1070_s10 }
  0xe0   : > { %p18_p13 = scmp.ge.s32.totalorder %s21_s14, 4   ;;  %s1641_s10 = smov %s1074_s11 }
  0xe1   : > { %s1642_s11 = smov %s1166_s23  ;;  %s1643_s12 = smov %s1082_s13 }
  0xe2   : > { %s1644_s13 = smov %s1646_s17  ;;  %20 = sbr.rel (!%p18_p13) target bundleno = 8 (0x8), region = 103 }
  0xe9   :  { %667 = vsyncpa [#allocation3], 1 }
  0xea   :  { %669 = vsyncpa [#allocation3 + $0x1], 1 }
  0xeb   :  { %670 = vsyncpa [#allocation6], 1 }
  0xec   :  { %672 = vsyncpa [#allocation6 + $0x1], 1 }
  0xed   :  { %673 = vsyncpa [#allocation4], 1 }
  0xee   :  { %675 = vsyncpa [#allocation4 + $0x1], 1 }

</bundles_post_ra>
